<compile_context>
chip_gen: v6e
topology: v6e:2x2x1
jax: 0.10.0
libtpu: 0.0.40
codegen_flags: <defaults>
</compile_context>

<pallas_src>
import functools

import jax
import jax.numpy as jnp
from jax.experimental import pallas as pl
from jax.experimental.pallas import tpu as pltpu


def _round_up(x, m):
    return ((x + m - 1) // m) * m


# ----------------------------------------------------------------------------
# Fused dual-encoder kernel body (grid = (batch_tiles, k_tiles))
# ----------------------------------------------------------------------------
def _dual_encoder_kernel(
    x_img_ref,            # [tb, tk]       bf16  (flattened image K-tile)
    pooled_ref,           # [tb, Dt]       bf16  (mean-pooled token embeddings)
    w_ie_ref, b_ie_ref,   # [tk, HID] bf16, [1, HID] f32
    w_te_ref, b_te_ref,   # [Dt, HID] bf16, [1, HID] f32
    w_pi_ref, b_pi_ref,   # [HID, EP] bf16, [1, EP] f32   (image projection)
    w_pt_ref, b_pt_ref,   # [HID, EP] bf16, [1, EP] f32   (text projection)
    img_out_ref,          # [tb, EP] f32  (lane-dense; padded cols are exact zeros)
    txt_out_ref,          # [tb, EP] f32
    acc_ref,              # VMEM scratch [tb, HID] f32  (image-encoder accumulator)
):
    k = pl.program_id(1)

    @pl.when(k == 0)
    def _():
        acc_ref[...] = jnp.zeros_like(acc_ref)

    # --- image encoder partial matmul over this K tile (MXU, f32 accumulate) ---
    acc_ref[...] += jnp.dot(x_img_ref[...], w_ie_ref[...],
                            preferred_element_type=jnp.float32)

    @pl.when(k == pl.num_programs(1) - 1)
    def _():
        # image encoder finalize: bias + relu
        img_h = jnp.maximum(acc_ref[...] + b_ie_ref[...], 0.0)

        # text encoder: relu(pooled @ W + b)  (pooled over S already, in glue)
        txt_h = jnp.dot(pooled_ref[...], w_te_ref[...],
                        preferred_element_type=jnp.float32)
        txt_h = jnp.maximum(txt_h + b_te_ref[...], 0.0)

        # projection heads directly from the vreg-resident activations
        img_p = jnp.dot(img_h.astype(jnp.bfloat16), w_pi_ref[...],
                        preferred_element_type=jnp.float32) + b_pi_ref[...]
        txt_p = jnp.dot(txt_h.astype(jnp.bfloat16), w_pt_ref[...],
                        preferred_element_type=jnp.float32) + b_pt_ref[...]

        # F.normalize(dim=-1): x / max(||x||, 1e-12) == x * rsqrt(max(||x||^2, 1e-24))
        eps2 = jnp.float32(1e-24)
        img_inv = jax.lax.rsqrt(
            jnp.maximum(jnp.sum(img_p * img_p, axis=-1, keepdims=True), eps2))
        txt_inv = jax.lax.rsqrt(
            jnp.maximum(jnp.sum(txt_p * txt_p, axis=-1, keepdims=True), eps2))
        img_out_ref[...] = img_p * img_inv
        txt_out_ref[...] = txt_p * txt_inv


def fused_dual_encoder(x_img, pooled, w_ie, b_ie, w_te, b_te,
                       w_pi, b_pi, w_pt, b_pt):
    bp, f_pad = x_img.shape
    dt = pooled.shape[1]
    hid = w_ie.shape[1]
    ep = w_pi.shape[1]

    # batch tile (parallel axis) and image-reduction tile (arbitrary axis)
    tb = bp if bp < 128 else 128
    tk = min(512, f_pad)
    assert bp % tb == 0 and f_pad % tk == 0
    nb, nk = bp // tb, f_pad // tk

    # VMEM budget: double-buffered blocks + resident weights + scratch, 2x headroom.
    est = 2 * (tb * tk * 2 + tk * hid * 2 + tb * dt * 2 + dt * hid * 2
               + 2 * hid * 4 + 2 * hid * ep * 2 + 2 * ep * 4 + 2 * tb * ep * 4)
    est += tb * hid * 4
    vmem_bytes = int(min(max(2 * est, 16 * 2 ** 20), 64 * 2 ** 20))

    grid_spec = pltpu.PrefetchScalarGridSpec(
        num_scalar_prefetch=0,
        grid=(nb, nk),
        in_specs=[
            pl.BlockSpec((tb, tk), lambda i, k: (i, k)),     # x_img K-tiled
            pl.BlockSpec((tb, dt), lambda i, k: (i, 0)),     # pooled text (const in k)
            pl.BlockSpec((tk, hid), lambda i, k: (k, 0)),    # w_ie K-tiled, const in batch
            pl.BlockSpec((1, hid), lambda i, k: (0, 0)),     # b_ie   (resident)
            pl.BlockSpec((dt, hid), lambda i, k: (0, 0)),    # w_te   (resident)
            pl.BlockSpec((1, hid), lambda i, k: (0, 0)),     # b_te
            pl.BlockSpec((hid, ep), lambda i, k: (0, 0)),    # w_pi
            pl.BlockSpec((1, ep), lambda i, k: (0, 0)),      # b_pi
            pl.BlockSpec((hid, ep), lambda i, k: (0, 0)),    # w_pt
            pl.BlockSpec((1, ep), lambda i, k: (0, 0)),      # b_pt
        ],
        out_specs=(
            pl.BlockSpec((tb, ep), lambda i, k: (i, 0)),
            pl.BlockSpec((tb, ep), lambda i, k: (i, 0)),
        ),
        scratch_shapes=[pltpu.VMEM((tb, hid), jnp.float32)],
    )

    return pl.pallas_call(
        _dual_encoder_kernel,
        out_shape=(jax.ShapeDtypeStruct((bp, ep), jnp.float32),
                   jax.ShapeDtypeStruct((bp, ep), jnp.float32)),
        grid_spec=grid_spec,
        compiler_params=pltpu.CompilerParams(
            dimension_semantics=("parallel", "arbitrary"),
            vmem_limit_bytes=vmem_bytes),
    )(x_img, pooled, w_ie, b_ie, w_te, b_te, w_pi, b_pi, w_pt, b_pt)


# ----------------------------------------------------------------------------
# Parameters: logical (PyTorch-like) init + zero-padded, kernel-ready layout
# ----------------------------------------------------------------------------
def init_params(key, *, img_flat_dim, img_out_dim, vocab, tok_dim, txt_out_dim,
                embed_dim):
    ks = jax.random.split(key, 5)

    def lin(k, fan_in, fan_out):
        bound = 1.0 / jnp.sqrt(fan_in)
        kw, kb = jax.random.split(k)
        w = jax.random.uniform(kw, (fan_in, fan_out), jnp.float32, -bound, bound)
        b = jax.random.uniform(kb, (1, fan_out), jnp.float32, -bound, bound)
        return w, b

    p = {}
    p["img_enc_w"], p["img_enc_b"] = lin(ks[0], img_flat_dim, img_out_dim)
    p["token_embed"] = jax.random.normal(ks[1], (vocab, tok_dim), jnp.float32)
    p["txt_enc_w"], p["txt_enc_b"] = lin(ks[2], tok_dim, txt_out_dim)
    p["img_proj_w"], p["img_proj_b"] = lin(ks[3], img_out_dim, embed_dim)
    p["txt_proj_w"], p["txt_proj_b"] = lin(ks[4], txt_out_dim, embed_dim)
    return p


def pad_params(p):
    """Zero-pad to lane-dense widths (multiples of 128); matmul weights -> bf16."""
    img_flat, img_out = p["img_enc_w"].shape
    tok_dim, txt_out = p["txt_enc_w"].shape
    embed = p["img_proj_w"].shape[1]
    hid = _round_up(max(img_out, txt_out), 128)
    ep = _round_up(embed, 128)
    dt = _round_up(tok_dim, 128)
    # image reduction dim padded so the wrapper can use a 512-wide K tile
    f_pad = _round_up(img_flat, 512) if img_flat > 512 else _round_up(img_flat, 128)

    def pad2(a, shape, dtype):
        out = jnp.zeros(shape, dtype)
        return out.at[: a.shape[0], : a.shape[1]].set(a.astype(dtype))

    return {
        "token_embed": pad2(p["token_embed"],
                            (p["token_embed"].shape[0], dt), jnp.bfloat16),
        "w_ie": pad2(p["img_enc_w"], (f_pad, hid), jnp.bfloat16),
        "b_ie": pad2(p["img_enc_b"], (1, hid), jnp.float32),
        "w_te": pad2(p["txt_enc_w"], (dt, hid), jnp.bfloat16),
        "b_te": pad2(p["txt_enc_b"], (1, hid), jnp.float32),
        "w_pi": pad2(p["img_proj_w"], (hid, ep), jnp.bfloat16),
        "b_pi": pad2(p["img_proj_b"], (1, ep), jnp.float32),
        "w_pt": pad2(p["txt_proj_w"], (hid, ep), jnp.bfloat16),
        "b_pt": pad2(p["txt_proj_b"], (1, ep), jnp.float32),
    }


# ----------------------------------------------------------------------------
# Forward (glue: flatten / embed-gather / pool / pad, then one fused kernel)
# ----------------------------------------------------------------------------
def image_text_retrieval_forward(q, images, captions, *, embed_dim):
    """images: [B, C, H, W] f32 (NCHW);  captions: [B, S] int32 token ids."""
    B = images.shape[0]
    b_pad = _round_up(max(B, 16), 16)          # bf16 packs 2 rows / sublane
    if b_pad >= 128:
        b_pad = _round_up(b_pad, 128)

    # image branch glue: flatten NCHW, zero-pad batch + reduction dim, bf16 for MXU
    f_pad = q["w_ie"].shape[0]
    x_img = images.reshape(B, -1)
    x_img = jnp.pad(x_img, ((0, b_pad - B), (0, f_pad - x_img.shape[1])))
    x_img = x_img.astype(jnp.bfloat16)

    # text branch glue: bf16 token gather + f32 mean-pool over S, so only a
    # [Bp, Dt_pad] bf16 block enters the kernel (S x less kernel DMA).
    # TODO(synk): for very large vocab/seq, move the gather in-kernel via
    # PrefetchScalarGridSpec scalar prefetch of the caption ids.
    tok = jnp.take(q["token_embed"], captions, axis=0)       # [B, S, Dt_pad] bf16
    pooled = jnp.mean(tok.astype(jnp.float32), axis=1)       # [B, Dt_pad] f32
    pooled = jnp.pad(pooled, ((0, b_pad - B), (0, 0))).astype(jnp.bfloat16)

    img_out, txt_out = fused_dual_encoder(
        x_img, pooled,
        q["w_ie"], q["b_ie"], q["w_te"], q["b_te"],
        q["w_pi"], q["b_pi"], q["w_pt"], q["b_pt"])

    # drop batch padding and lane padding
    return img_out[:B, :embed_dim], txt_out[:B, :embed_dim]


# ----------------------------------------------------------------------------
# Pure-JAX f32 reference (same assumed encoder structure) for validation
# ----------------------------------------------------------------------------
def reference_forward(p, images, captions):
    B = images.shape[0]
    x = images.reshape(B, -1)
    img_h = jnp.maximum(x @ p["img_enc_w"] + p["img_enc_b"], 0.0)
    tok = p["token_embed"][captions]
    txt_h = jnp.maximum(jnp.mean(tok, axis=1) @ p["txt_enc_w"] + p["txt_enc_b"], 0.0)
    img_p = img_h @ p["img_proj_w"] + p["img_proj_b"]
    txt_p = txt_h @ p["txt_proj_w"] + p["txt_proj_b"]

    def norm(v):
        return v / jnp.maximum(jnp.linalg.norm(v, axis=-1, keepdims=True), 1e-12)

    return norm(img_p), norm(txt_p)


# ----------------------------------------------------------------------------
# Entry point
# ----------------------------------------------------------------------------
if __name__ == "__main__":
    B, C, H, W = 2, 4, 16, 16       # images: [2, 4, 16, 16]
    S = 8                           # caption length
    VOCAB, TOK_DIM = 64, 32
    IMG_OUT, TXT_OUT = 32, 32       # encoder output_dim
    EMBED_DIM = 32

    key = jax.random.PRNGKey(0)
    k_img, k_cap, k_par = jax.random.split(key, 3)

    images = jax.random.normal(k_img, (B, C, H, W), jnp.float32)
    captions = jax.random.randint(k_cap, (B, S), 0, VOCAB, jnp.int32)

    params = init_params(
        k_par,
        img_flat_dim=C * H * W, img_out_dim=IMG_OUT,
        vocab=VOCAB, tok_dim=TOK_DIM, txt_out_dim=TXT_OUT,
        embed_dim=EMBED_DIM,
    )
    padded = pad_params(params)

    fwd = jax.jit(functools.partial(image_text_retrieval_forward,
                                    embed_dim=EMBED_DIM))
    img_emb, txt_emb = fwd(padded, images, captions)
    jax.block_until_ready((img_emb, txt_emb))

    # sanity: shapes, unit norms, and agreement with the f32 reference
    assert img_emb.shape == (B, EMBED_DIM) and txt_emb.shape == (B, EMBED_DIM)
    assert jnp.allclose(jnp.linalg.norm(img_emb, axis=-1), 1.0, atol=1e-3)
    assert jnp.allclose(jnp.linalg.norm(txt_emb, axis=-1), 1.0, atol=1e-3)

    ref_img, ref_txt = reference_forward(params, images, captions)
    # bf16 matmul operands -> loose tolerance vs the f32 reference
    assert jnp.allclose(img_emb, ref_img, atol=2e-2), \
        float(jnp.max(jnp.abs(img_emb - ref_img)))
    assert jnp.allclose(txt_emb, ref_txt, atol=2e-2), \
        float(jnp.max(jnp.abs(txt_emb - ref_txt)))

    print("KERNEL_OK")
</pallas_src>

<mosaic_0001>
module attributes {stable_mosaic.version = 11 : i64} {
  func.func @_dual_encoder_kernel(%arg0: i32, %arg1: i32, %arg2: memref<16x512xbf16, #tpu.memory_space<vmem>>, %arg3: memref<16x128xbf16, #tpu.memory_space<vmem>>, %arg4: memref<512x128xbf16, #tpu.memory_space<vmem>>, %arg5: memref<1x128xf32, #tpu.memory_space<vmem>>, %arg6: memref<128x128xbf16, #tpu.memory_space<vmem>>, %arg7: memref<1x128xf32, #tpu.memory_space<vmem>>, %arg8: memref<128x128xbf16, #tpu.memory_space<vmem>>, %arg9: memref<1x128xf32, #tpu.memory_space<vmem>>, %arg10: memref<128x128xbf16, #tpu.memory_space<vmem>>, %arg11: memref<1x128xf32, #tpu.memory_space<vmem>>, %arg12: memref<16x128xf32, #tpu.memory_space<vmem>>, %arg13: memref<16x128xf32, #tpu.memory_space<vmem>>, %arg14: memref<16x128xf32, #tpu.memory_space<vmem>>) attributes {dimension_semantics = [#tpu.dimension_semantics<parallel>, #tpu.dimension_semantics<arbitrary>], iteration_bounds = array<i64: 1, 2>, scalar_prefetch = 0 : i64, scratch_operands = 1 : i64, tpu.core_type = #tpu.core_type<tc>, window_params = [{transform_indices = @transform_0, window_bounds = array<i64: 16, 512>}, {transform_indices = @transform_1, window_bounds = array<i64: 16, 128>}, {transform_indices = @transform_2, window_bounds = array<i64: 512, 128>}, {pipeline_mode = #tpu.pipeline_mode<synchronous>, transform_indices = @transform_3, window_bounds = array<i64: 1, 128>}, {pipeline_mode = #tpu.pipeline_mode<synchronous>, transform_indices = @transform_4, window_bounds = array<i64: 128, 128>}, {pipeline_mode = #tpu.pipeline_mode<synchronous>, transform_indices = @transform_5, window_bounds = array<i64: 1, 128>}, {pipeline_mode = #tpu.pipeline_mode<synchronous>, transform_indices = @transform_6, window_bounds = array<i64: 128, 128>}, {pipeline_mode = #tpu.pipeline_mode<synchronous>, transform_indices = @transform_7, window_bounds = array<i64: 1, 128>}, {pipeline_mode = #tpu.pipeline_mode<synchronous>, transform_indices = @transform_8, window_bounds = array<i64: 128, 128>}, {pipeline_mode = #tpu.pipeline_mode<synchronous>, transform_indices = @transform_9, window_bounds = array<i64: 1, 128>}, {transform_indices = @transform_10, window_bounds = array<i64: 16, 128>}, {transform_indices = @transform_11, window_bounds = array<i64: 16, 128>}]} {
    %c0_i32 = arith.constant 0 : i32
    %0 = arith.cmpi eq, %arg1, %c0_i32 : i32
    %1 = arith.extui %0 : i1 to i32
    %c0_i32_0 = arith.constant 0 : i32
    %2 = arith.cmpi ne, %1, %c0_i32_0 : i32
    scf.if %2 {
      %cst_9 = arith.constant 0.000000e+00 : f32
      %12 = vector.broadcast %cst_9 : f32 to vector<16x128xf32>
      %c0_10 = arith.constant 0 : index
      %c0_11 = arith.constant 0 : index
      %13 = vector.load %arg14[%c0_10, %c0_11] : memref<16x128xf32, #tpu.memory_space<vmem>>, vector<16x128xf32>
      tpu.vector_store %arg14[%c0_10, %c0_11], %12 {strides = array<i32>} : memref<16x128xf32, #tpu.memory_space<vmem>>, vector<16x128xf32>,
    } else {
    }
    %c0 = arith.constant 0 : index
    %c0_1 = arith.constant 0 : index
    %3 = vector.load %arg14[%c0, %c0_1] : memref<16x128xf32, #tpu.memory_space<vmem>>, vector<16x128xf32>
    %c0_2 = arith.constant 0 : index
    %c0_3 = arith.constant 0 : index
    %4 = vector.load %arg2[%c0_2, %c0_3] : memref<16x512xbf16, #tpu.memory_space<vmem>>, vector<16x512xbf16>
    %c0_4 = arith.constant 0 : index
    %c0_5 = arith.constant 0 : index
    %5 = vector.load %arg4[%c0_4, %c0_5] : memref<512x128xbf16, #tpu.memory_space<vmem>>, vector<512x128xbf16>
    %cst = arith.constant dense<0.000000e+00> : vector<16x128xf32>
    %6 = tpu.matmul %4, %5, %cst {dimension_numbers = #tpu.dot_dimension_numbers<[1], [0], [0], [1], [0, 0, 1, 1], [], []>} : vector<16x512xbf16>, vector<512x128xbf16>, vector<16x128xf32> -> vector<16x128xf32>
    %7 = arith.addf %3, %6 : vector<16x128xf32>
    %c0_6 = arith.constant 0 : index
    %c0_7 = arith.constant 0 : index
    %8 = vector.load %arg14[%c0_6, %c0_7] : memref<16x128xf32, #tpu.memory_space<vmem>>, vector<16x128xf32>
    tpu.vector_store %arg14[%c0_6, %c0_7], %7 {strides = array<i32>} : memref<16x128xf32, #tpu.memory_space<vmem>>, vector<16x128xf32>,
    %c1_i32 = arith.constant 1 : i32
    %9 = arith.cmpi eq, %arg1, %c1_i32 : i32
    %10 = arith.extui %9 : i1 to i32
    %c0_i32_8 = arith.constant 0 : i32
    %11 = arith.cmpi ne, %10, %c0_i32_8 : i32
    scf.if %11 {
      %c0_9 = arith.constant 0 : index
      %c0_10 = arith.constant 0 : index
      %12 = vector.load %arg14[%c0_9, %c0_10] : memref<16x128xf32, #tpu.memory_space<vmem>>, vector<16x128xf32>
      %c0_11 = arith.constant 0 : index
      %c0_12 = arith.constant 0 : index
      %13 = vector.load %arg5[%c0_11, %c0_12] : memref<1x128xf32, #tpu.memory_space<vmem>>, vector<1x128xf32>
      %14 = vector.broadcast %13 : vector<1x128xf32> to vector<16x128xf32>
      %15 = arith.addf %12, %14 : vector<16x128xf32>
      %cst_13 = arith.constant 0.000000e+00 : f32
      %16 = vector.broadcast %cst_13 : f32 to vector<16x128xf32>
      %17 = arith.maximumf %15, %16 : vector<16x128xf32>
      %c0_14 = arith.constant 0 : index
      %c0_15 = arith.constant 0 : index
      %18 = vector.load %arg3[%c0_14, %c0_15] : memref<16x128xbf16, #tpu.memory_space<vmem>>, vector<16x128xbf16>
      %c0_16 = arith.constant 0 : index
      %c0_17 = arith.constant 0 : index
      %19 = vector.load %arg6[%c0_16, %c0_17] : memref<128x128xbf16, #tpu.memory_space<vmem>>, vector<128x128xbf16>
      %cst_18 = arith.constant dense<0.000000e+00> : vector<16x128xf32>
      %20 = tpu.matmul %18, %19, %cst_18 {dimension_numbers = #tpu.dot_dimension_numbers<[1], [0], [0], [1], [0, 0, 1, 1], [], []>} : vector<16x128xbf16>, vector<128x128xbf16>, vector<16x128xf32> -> vector<16x128xf32>
      %c0_19 = arith.constant 0 : index
      %c0_20 = arith.constant 0 : index
      %21 = vector.load %arg7[%c0_19, %c0_20] : memref<1x128xf32, #tpu.memory_space<vmem>>, vector<1x128xf32>
      %22 = vector.broadcast %21 : vector<1x128xf32> to vector<16x128xf32>
      %23 = arith.addf %20, %22 : vector<16x128xf32>
      %cst_21 = arith.constant 0.000000e+00 : f32
      %24 = vector.broadcast %cst_21 : f32 to vector<16x128xf32>
      %25 = arith.maximumf %23, %24 : vector<16x128xf32>
      %26 = arith.truncf %17 : vector<16x128xf32> to vector<16x128xbf16>
      %c0_22 = arith.constant 0 : index
      %c0_23 = arith.constant 0 : index
      %27 = vector.load %arg8[%c0_22, %c0_23] : memref<128x128xbf16, #tpu.memory_space<vmem>>, vector<128x128xbf16>
      %cst_24 = arith.constant dense<0.000000e+00> : vector<16x128xf32>
      %28 = tpu.matmul %26, %27, %cst_24 {dimension_numbers = #tpu.dot_dimension_numbers<[1], [0], [0], [1], [0, 0, 1, 1], [], []>} : vector<16x128xbf16>, vector<128x128xbf16>, vector<16x128xf32> -> vector<16x128xf32>
      %c0_25 = arith.constant 0 : index
      %c0_26 = arith.constant 0 : index
      %29 = vector.load %arg9[%c0_25, %c0_26] : memref<1x128xf32, #tpu.memory_space<vmem>>, vector<1x128xf32>
      %30 = vector.broadcast %29 : vector<1x128xf32> to vector<16x128xf32>
      %31 = arith.addf %28, %30 : vector<16x128xf32>
      %32 = arith.truncf %25 : vector<16x128xf32> to vector<16x128xbf16>
      %c0_27 = arith.constant 0 : index
      %c0_28 = arith.constant 0 : index
      %33 = vector.load %arg10[%c0_27, %c0_28] : memref<128x128xbf16, #tpu.memory_space<vmem>>, vector<128x128xbf16>
      %cst_29 = arith.constant dense<0.000000e+00> : vector<16x128xf32>
      %34 = tpu.matmul %32, %33, %cst_29 {dimension_numbers = #tpu.dot_dimension_numbers<[1], [0], [0], [1], [0, 0, 1, 1], [], []>} : vector<16x128xbf16>, vector<128x128xbf16>, vector<16x128xf32> -> vector<16x128xf32>
      %c0_30 = arith.constant 0 : index
      %c0_31 = arith.constant 0 : index
      %35 = vector.load %arg11[%c0_30, %c0_31] : memref<1x128xf32, #tpu.memory_space<vmem>>, vector<1x128xf32>
      %36 = vector.broadcast %35 : vector<1x128xf32> to vector<16x128xf32>
      %37 = arith.addf %34, %36 : vector<16x128xf32>
      %38 = arith.mulf %31, %31 : vector<16x128xf32>
      %cst_32 = arith.constant dense<0.000000e+00> : vector<16xf32>
      %39 = vector.multi_reduction <add>, %38, %cst_32 [1] : vector<16x128xf32> to vector<16xf32>
      %40 = vector.shape_cast %39 : vector<16xf32> to vector<16x1xf32>
      %cst_33 = arith.constant 1.000000e-24 : f32
      %41 = vector.broadcast %cst_33 : f32 to vector<16x1xf32>
      %42 = arith.maximumf %40, %41 : vector<16x1xf32>
      %43 = math.rsqrt %42 : vector<16x1xf32>
      %44 = arith.mulf %37, %37 : vector<16x128xf32>
      %cst_34 = arith.constant dense<0.000000e+00> : vector<16xf32>
      %45 = vector.multi_reduction <add>, %44, %cst_34 [1] : vector<16x128xf32> to vector<16xf32>
      %46 = vector.shape_cast %45 : vector<16xf32> to vector<16x1xf32>
      %cst_35 = arith.constant 1.000000e-24 : f32
      %47 = vector.broadcast %cst_35 : f32 to vector<16x1xf32>
      %48 = arith.maximumf %46, %47 : vector<16x1xf32>
      %49 = math.rsqrt %48 : vector<16x1xf32>
      %50 = vector.broadcast %43 : vector<16x1xf32> to vector<16x128xf32>
      %51 = arith.mulf %31, %50 : vector<16x128xf32>
      %c0_36 = arith.constant 0 : index
      %c0_37 = arith.constant 0 : index
      %52 = vector.load %arg12[%c0_36, %c0_37] : memref<16x128xf32, #tpu.memory_space<vmem>>, vector<16x128xf32>
      tpu.vector_store %arg12[%c0_36, %c0_37], %51 {strides = array<i32>} : memref<16x128xf32, #tpu.memory_space<vmem>>, vector<16x128xf32>,
      %53 = vector.broadcast %49 : vector<16x1xf32> to vector<16x128xf32>
      %54 = arith.mulf %37, %53 : vector<16x128xf32>
      %c0_38 = arith.constant 0 : index
      %c0_39 = arith.constant 0 : index
      %55 = vector.load %arg13[%c0_38, %c0_39] : memref<16x128xf32, #tpu.memory_space<vmem>>, vector<16x128xf32>
      tpu.vector_store %arg13[%c0_38, %c0_39], %54 {strides = array<i32>} : memref<16x128xf32, #tpu.memory_space<vmem>>, vector<16x128xf32>,
    } else {
    }
    return
  }
  func.func @transform_0(%arg0: i32, %arg1: i32) -> (i32, i32) {
    %c0_i32 = arith.constant 0 : i32
    return %arg0, %arg1 : i32, i32
  }
  func.func @transform_1(%arg0: i32, %arg1: i32) -> (i32, i32) {
    %c0_i32 = arith.constant 0 : i32
    %c0_i32_0 = arith.constant 0 : i32
    return %arg0, %c0_i32 : i32, i32
  }
  func.func @transform_2(%arg0: i32, %arg1: i32) -> (i32, i32) {
    %c0_i32 = arith.constant 0 : i32
    %c0_i32_0 = arith.constant 0 : i32
    return %arg1, %c0_i32 : i32, i32
  }
  func.func @transform_3(%arg0: i32, %arg1: i32) -> (i32, i32) {
    %c0_i32 = arith.constant 0 : i32
    %c0_i32_0 = arith.constant 0 : i32
    %c0_i32_1 = arith.constant 0 : i32
    return %c0_i32, %c0_i32_0 : i32, i32
  }
  func.func @transform_4(%arg0: i32, %arg1: i32) -> (i32, i32) {
    %c0_i32 = arith.constant 0 : i32
    %c0_i32_0 = arith.constant 0 : i32
    %c0_i32_1 = arith.constant 0 : i32
    return %c0_i32, %c0_i32_0 : i32, i32
  }
  func.func @transform_5(%arg0: i32, %arg1: i32) -> (i32, i32) {
    %c0_i32 = arith.constant 0 : i32
    %c0_i32_0 = arith.constant 0 : i32
    %c0_i32_1 = arith.constant 0 : i32
    return %c0_i32, %c0_i32_0 : i32, i32
  }
  func.func @transform_6(%arg0: i32, %arg1: i32) -> (i32, i32) {
    %c0_i32 = arith.constant 0 : i32
    %c0_i32_0 = arith.constant 0 : i32
    %c0_i32_1 = arith.constant 0 : i32
    return %c0_i32, %c0_i32_0 : i32, i32
  }
  func.func @transform_7(%arg0: i32, %arg1: i32) -> (i32, i32) {
    %c0_i32 = arith.constant 0 : i32
    %c0_i32_0 = arith.constant 0 : i32
    %c0_i32_1 = arith.constant 0 : i32
    return %c0_i32, %c0_i32_0 : i32, i32
  }
  func.func @transform_8(%arg0: i32, %arg1: i32) -> (i32, i32) {
    %c0_i32 = arith.constant 0 : i32
    %c0_i32_0 = arith.constant 0 : i32
    %c0_i32_1 = arith.constant 0 : i32
    return %c0_i32, %c0_i32_0 : i32, i32
  }
  func.func @transform_9(%arg0: i32, %arg1: i32) -> (i32, i32) {
    %c0_i32 = arith.constant 0 : i32
    %c0_i32_0 = arith.constant 0 : i32
    %c0_i32_1 = arith.constant 0 : i32
    return %c0_i32, %c0_i32_0 : i32, i32
  }
  func.func @transform_10(%arg0: i32, %arg1: i32) -> (i32, i32) {
    %c0_i32 = arith.constant 0 : i32
    %c0_i32_0 = arith.constant 0 : i32
    return %arg0, %c0_i32 : i32, i32
  }
  func.func @transform_11(%arg0: i32, %arg1: i32) -> (i32, i32) {
    %c0_i32 = arith.constant 0 : i32
    %c0_i32_0 = arith.constant 0 : i32
    return %arg0, %c0_i32 : i32, i32
  }
}

</mosaic_0001>

<bundles_post_ra>
// kernel: image_text_retrieval_forward.1
= control target key start
LH: loop header
LB: loop body
LE: loop exit
PB: predicated region body
PF: predicated region fallthrough
CT: control target
= control target key end

     0   :  { %s2170_s0 = inlined_call_operand.vmem [shape: bf16[16,1024], index: 0, kind: input, shape index: {}]   ;;  %s2171_s1 = inlined_call_operand.vmem [shape: bf16[16,128], index: 1, kind: input, shape index: {}]   ;;  %s2172_s2 = inlined_call_operand.hbm [shape: bf16[1024,128], index: 2, kind: input, shape index: {}]   ;;  %s2173_s3 = inlined_call_operand.vmem [shape: f32[1,128], index: 3, kind: input, shape index: {}]   ;;  %s2174_s4 = inlined_call_operand.vmem [shape: bf16[128,128], index: 4, kind: input, shape index: {}]   ;;  %s2175_s5 = inlined_call_operand.vmem [shape: f32[1,128], index: 5, kind: input, shape index: {}]   ;;  %s2176_s6 = inlined_call_operand.vmem [shape: bf16[128,128], index: 6, kind: input, shape index: {}]   ;;  %s2177_s7 = inlined_call_operand.vmem [shape: f32[1,128], index: 7, kind: input, shape index: {}]   ;;  %s2178_s8 = inlined_call_operand.vmem [shape: bf16[128,128], index: 8, kind: input, shape index: {}]   ;;  %s2179_s9 = inlined_call_operand.vmem [shape: f32[1,128], index: 9, kind: input, shape index: {}]   ;;  %s2180_s10 = inlined_call_operand.vmem [shape: f32[16,128], index: 10, kind: output, shape index: {0}]   ;;  %s2181_s11 = inlined_call_operand.vmem [shape: f32[16,128], index: 11, kind: output, shape index: {1}]  }
   0x1   :  { %2183 = sst [smem:[#allocation9_spill]] %s2170_s0 }
   0x2   :  { %17 = vsyncpa [#allocation5], 0 }
   0x3   :  { %19 = vsyncpa [#allocation5 + $0x1], 0  ;;  %s1907_s17 = smov 0   ;;  %s1909_s18 = smov 0  }
   0x4   :  { %s1911_s19 = smov 0   ;;  %s1913_s20 = smov 0  }
   0x5   :  { %s1915_s21 = smov 0   ;;  %s1917_s22 = smov 0  }
   0x6 LB: > { %s1418_s23 = sadd.s32 4294967295, %s1839_s22   ;;  %s34_s24 = sadd.s32 1, %s1835_s21  ;;  %s1839_s22 = sphi %s1917_s22, %s25_s22   ;;  %s1835_s21 = sphi %s1915_s21, %s2195_s21   ;;  %s1831_s20 = sphi %s1913_s20, %s2194_s20   ;;  %s1827_s19 = sphi %s1911_s19, %s2193_s19   ;;  %s1823_s18 = sphi %s1909_s18, %s2192_s18   ;;  %s1819_s17 = sphi %s1907_s17, %s2191_s17  }
   0x7   : > { %p35_p0 = scmp.ge.s32.totalorder %s34_s24, 2  ;;  %s46_s25 = sadd.s32 1, %s1827_s19 }
   0x8   : > { %p53_p1 = scmp.ne.s32.totalorder %s1827_s19, %s1823_s18  ;;  %p54_p2 = scmp.eq.s32.totalorder %s1839_s22, 0 }
   0x9   : > { %s2197_s24 = smov (%p35_p0, %s34_s24), 0  ;;  %p111_p4 = scmp.ne.s32.totalorder %s1823_s18, %s1819_s17 }
   0xa   : > { %2184 = sst [smem:[#allocation7_spill]] %s2197_s24  ;;  %p1943_p3 = por %p54_p2, %p53_p1 }
   0xb   : > { %s42_s27 = ssub.s32 %s1835_s21, %s2197_s24  ;;  %p112_p5 = scmp.eq.s32.totalorder %s1418_s23, 0 }
   0xc   : > { %p44_p6 = scmp.eq.s32.totalorder %s42_s27, 0  ;;  %p1421_p8 = scmp.ge.s32.totalorder %s1839_s22, 2 }
   0xd   : > { %p1950_p7 = por %p112_p5, %p111_p4 }
   0xe   : > { %s1955_s29 = scalar_select %p44_p6, %s1827_s19, %s46_s25  }
   0xf   : > { %360 = sbr.rel (%p1421_p8) target bundleno = 48 (0x30), region = 48 }
  0x10   : > { %2187 = sst [smem:[#allocation8_spill]] %s1955_s29 }
  0x14   : > { %363 = sbr.rel (!%p1943_p3) target bundleno = 32 (0x20), region = 52  ;;  %s365_s30 = sand.u32 (%p1943_p3), 1, %s1827_s19  }
  0x15   : > { %s1504_s12 = sshll.u32 (%p1943_p3), %s1835_s21, 4  ;;  %s1422_s13 = sshll.u32 (%p1943_p3), %s365_s30, 5 }
  0x16   : > { %s2188_s0 = sld [smem:[#allocation9_spill]] (%p1943_p3)  ;;  %s367_s17 = scalar_lea.vmem (%p1943_p3), [#allocation3], %s1422_s13 }
  0x1c   : > { %s373_s16 = scalar_lea.vmem %s2188_s0, %s1504_s12 }
  0x1d   : > { %v386_v0 = vld [vmem:[%s373_s16] sm:$0xff]  ;;  %v388_v1 = vld [vmem:[%s373_s16 + $0x8] sm:$0xff] }
  0x1e   : > { %v390_v2 = vld [vmem:[%s373_s16 + $0x20] sm:$0xff]  ;;  %387 = vst [vmem:[%s367_s17] sm:$0xff] %v386_v0  ;;  %389 = vst [vmem:[%s367_s17 + $0x8] sm:$0xff] %v388_v1  ;;  %v392_v3 = vld [vmem:[%s373_s16 + $0x28] sm:$0xff] }
  0x1f   : > { %391 = vst [vmem:[%s367_s17 + $0x10] sm:$0xff] %v390_v2  ;;  %393 = vst [vmem:[%s367_s17 + $0x18] sm:$0xff] %v392_v3 }
  0x20 PF: > { %s400_s23 = sand.u32 1, %s1827_s19   ;;  %s1505_s25 = sshll.u32 %s1835_s21, 12 }
  0x21   : > { %s1425_s27 = sshll.u32 %s400_s23, 8  ;;  %s410_s12 = scalar_lea.hbm %s2172_s2, %s1505_s25 }
  0x22   : > { %s404_s14 = scalar_lea.vmem [#allocation4], %s1425_s27  ;;  %s401_s13 = scalar_lea.sflag [#allocation5], %s400_s23 }
  0x23   : > { %s411_s15 = sshll.u32 %s404_s14, 4  ;;  %s1841_s16 = smov [#allocation4]   ;;  %s412_s15 = int_to_ptr.vmem [resolvable:$true] %s411_s15 }
  0x24   : > { %s1775_s0 = scalar_lea.vmem %s412_s15, 4096  ;;  %s1779_s17 = sshll.u32 %s1841_s16, 4  ;;  %s1780_s17 = int_to_ptr.vmem [resolvable:$false] %s1779_s17 }
  0x25   : > { %p1776_p9 = scmp.ne.s32.totalorder %s412_s15, %s1775_s0  ;;  %s1781_s29 = scalar_lea.vmem %s1780_s17, 8192 }
  0x26   : > { %p1782_p12 = scmp.lt.s32.totalorder %s412_s15, %s1780_s17  ;;  %p1783_p13 = scmp.lt.s32.totalorder %s1781_s29, %s1775_s0 }
  0x27   : > { %p1777_p10 = pnand %p1776_p9, %p1943_p3 }
  0x28   : > { %p1784_p0 = por %p1783_p13, %p1782_p12 }
  0x29   : > { %p1778_p11 = pneg %p1777_p10 }
  0x2b   : > { %p1785_p1 = pnand %p1784_p0, %p1778_p11 }
  0x2d   : > { %1788 = shalt.err (!%p1785_p1)
}
  0x2e   : > { %s1842_s24 = smov 64   ;;  %s1843_s25 = smov 4  }
  0x2f   : > { %1637 = dma.hbm_to_vmem [thread:$0]  (%p1943_p3), %s410_s12, 4096, %s412_s15, %s401_s13, %s1842_s24, %s1842_s24, %s1843_s25  }
  0x30 PF: > { %p1428_p2 = scmp.ge.s32.totalorder %s1839_s22, 1  ;;  %p419_p4 = scmp.lt.s32.totalorder %s1839_s22, 3 }
  0x32   : > { %p420_p5 = pnand %p1428_p2, %p419_p4 }
  0x33   : > { %s426_s23 = sand.u32 (!%p420_p5), 1, %s1823_s18  }
  0x34   : > { %423 = sbr.rel (%p420_p5) target bundleno = 902 (0x386), region = 79  ;;  %s1429_s27 = sshll.u32 (!%p420_p5), %s426_s23, 5 }
  0x35   : > { %s1430_s0 = sshll.u32 (!%p420_p5), %s426_s23, 8  ;;  %s1977_s29 = scalar_lea.vmem (!%p420_p5), [#allocation3], %s1429_s27 }
  0x36   : > { %s433_s30 = scalar_lea.sflag (!%p420_p5), [#allocation5], %s426_s23  ;;  %s1979_s14 = scalar_lea.vmem (!%p420_p5), [#allocation4], %s1430_s0 }
  0x39   : > { %1814 = dma.done.wait (%p1950_p7), %s433_s30, 4096  }
  0x3a   : > { %1816 = vsyncadd (%p1950_p7), %s433_s30, 4294963200  ;;  %p1431_p3 = scmp.ne.s32.totalorder %s1831_s20, 0 }
  0x3c   : > { %514 = sbr.rel (%p1431_p3) target bundleno = 67 (0x43), region = 91 }
  0x41   : > { %v1844_v4 = vmov 0.0  }
  0x42   : > { %515 = vst [vmem:[#allocation2] sm:$0xff] %v1844_v4  ;;  %516 = vst [vmem:[#allocation2 + $0x8] sm:$0xff] %v1844_v4 }
  0x43 PF: > { %v1692_v5 = vld [vmem:[%s1979_s14 + $0x78] sm:$0xff]   ;;  %v1696_v9 = vld [vmem:[%s1979_s14 + $0x70] sm:$0xff]   ;;  %v1700_v13 = vld [vmem:[%s1979_s14 + $0x68] sm:$0xff]   ;;  %p1468_p6 = scmp.ne.s32.totalorder %s1831_s20, 1 }
  0x44   : > { %v1693_v6 = vld [vmem:[%s1979_s14 + $0xf8] sm:$0xff]   ;;  %1506 = vmatprep.subr.bf16.mxu0 %v1692_v5  ;;  %v1697_v10 = vld [vmem:[%s1979_s14 + $0xf0] sm:$0xff]   ;;  %v1701_v14 = vld [vmem:[%s1979_s14 + $0xe8] sm:$0xff]  }
  0x45   : > { %v1694_v7 = vld [vmem:[%s1979_s14 + $0x38] sm:$0xff]   ;;  %1528 = vmatprep.subr.bf16.mxu1 %v1693_v6  ;;  %v1698_v11 = vld [vmem:[%s1979_s14 + $0x30] sm:$0xff]   ;;  %v1702_v15 = vld [vmem:[%s1979_s14 + $0x28] sm:$0xff]  }
  0x46   : > { %v1695_v8 = vld [vmem:[%s1979_s14 + $0xb8] sm:$0xff]   ;;  %1507 = vmatpush3.bf16.msra.mxu0 %v1694_v7  ;;  %v1699_v12 = vld [vmem:[%s1979_s14 + $0xb0] sm:$0xff]   ;;  %v1703_v16 = vld [vmem:[%s1979_s14 + $0xa8] sm:$0xff]  }
  0x47   : > { %1529 = vmatpush3.bf16.msra.mxu1 %v1695_v8  ;;  %1508 = vmatprep.subr.bf16.mxu0 %v1696_v9  ;;  %v1704_v17 = vld [vmem:[%s1979_s14 + $0x60] sm:$0xff]   ;;  %v1708_v21 = vld [vmem:[%s1979_s14 + $0x58] sm:$0xff]   ;;  %v1712_v25 = vld [vmem:[%s1979_s14 + $0x50] sm:$0xff]  }
  0x48   : > { %1530 = vmatprep.subr.bf16.mxu1 %v1697_v10  ;;  %v1705_v18 = vld [vmem:[%s1979_s14 + $0xe0] sm:$0xff]   ;;  %v1709_v22 = vld [vmem:[%s1979_s14 + $0xd8] sm:$0xff]   ;;  %v1713_v26 = vld [vmem:[%s1979_s14 + $0xd0] sm:$0xff]  }
  0x49   : > { %v1706_v19 = vld [vmem:[%s1979_s14 + $0x20] sm:$0xff]   ;;  %v1710_v23 = vld [vmem:[%s1979_s14 + $0x18] sm:$0xff]   ;;  %v1714_v27 = vld [vmem:[%s1979_s14 + $0x10] sm:$0xff]  }
  0x4a   : > { %1509 = vmatpush3.bf16.msra.mxu0 %v1698_v11  ;;  %v1707_v20 = vld [vmem:[%s1979_s14 + $0xa0] sm:$0xff]   ;;  %v1711_v24 = vld [vmem:[%s1979_s14 + $0x98] sm:$0xff]   ;;  %v1715_v28 = vld [vmem:[%s1979_s14 + $0x90] sm:$0xff]  }
  0x4b   : > { %1531 = vmatpush3.bf16.msra.mxu1 %v1699_v12  ;;  %1510 = vmatprep.subr.bf16.mxu0 %v1700_v13  ;;  %v1716_v29 = vld [vmem:[%s1979_s14 + $0x48] sm:$0xff]   ;;  %v1720_v33 = vld [vmem:[%s1979_s14 + $0x40] sm:$0xff]   ;;  %v517_v48 = vld [vmem:[#allocation2] sm:$0xff] }
  0x4c   : > { %1532 = vmatprep.subr.bf16.mxu1 %v1701_v14  ;;  %v1717_v30 = vld [vmem:[%s1979_s14 + $0xc8] sm:$0xff]   ;;  %v1721_v34 = vld [vmem:[%s1979_s14 + $0xc0] sm:$0xff]   ;;  %v518_v56 = vld [vmem:[#allocation2 + $0x8] sm:$0xff] }
  0x4d   : > { %v1718_v31 = vld [vmem:[%s1979_s14 + $0x8] sm:$0xff]   ;;  %v1722_v35 = vld [vmem:[%s1979_s14] sm:$0xff]  }
  0x4e   : > { %1511 = vmatpush3.bf16.msra.mxu0 %v1702_v15  ;;  %v1719_v32 = vld [vmem:[%s1979_s14 + $0x88] sm:$0xff]   ;;  %v1723_v36 = vld [vmem:[%s1979_s14 + $0x80] sm:$0xff]  }
  0x4f   : > { %1533 = vmatpush3.bf16.msra.mxu1 %v1703_v16  ;;  %1512 = vmatprep.subr.bf16.mxu0 %v1704_v17  ;;  %v1724_v37 = vld [vmem:[%s1977_s29] ss:$16 sps:$4 sm:$0xff]   ;;  %v1726_v38 = vld [vmem:[%s1977_s29 + $0x4] ss:$16 sps:$4 sm:$0xff]   ;;  %v1727_v39 = vld [vmem:[%s1977_s29 + $0x8] ss:$16 sps:$4 sm:$0xff]  }
  0x50   : > { %1534 = vmatprep.subr.bf16.mxu1 %v1705_v18  ;;  %v1729_v40 = vld [vmem:[%s1977_s29 + $0xc] ss:$16 sps:$4 sm:$0xff]   ;;  %831 = vmatprep.mubr.bf16.mxu0 %v1726_v38 }
  0x51   : > { %872 = vmatprep.mubr.bf16.mxu1 %v1729_v40 }
  0x52   : > { %1513 = vmatpush3.bf16.msra.mxu0 %v1706_v19 }
  0x53   : > { %1535 = vmatpush3.bf16.msra.mxu1 %v1707_v20  ;;  %1514 = vmatprep.subr.bf16.mxu0 %v1708_v21 }
  0x54   : > { %1536 = vmatprep.subr.bf16.mxu1 %v1709_v22 }
  0x56   : > { %1515 = vmatpush3.bf16.msra.mxu0 %v1710_v23 }
  0x57   : > { %1537 = vmatpush3.bf16.msra.mxu1 %v1711_v24  ;;  %1516 = vmatprep.subr.bf16.mxu0 %v1712_v25 }
  0x58   : > { %1538 = vmatprep.subr.bf16.mxu1 %v1713_v26 }
  0x5a   : > { %1517 = vmatpush3.bf16.msra.mxu0 %v1714_v27 }
  0x5b   : > { %1539 = vmatpush3.bf16.msra.mxu1 %v1715_v28  ;;  %1518 = vmatprep.subr.bf16.mxu0 %v1716_v29 }
  0x5c   : > { %1540 = vmatprep.subr.bf16.mxu1 %v1717_v30 }
  0x5e   : > { %1519 = vmatpush3.bf16.msra.mxu0 %v1718_v31 }
  0x5f   : > { %1541 = vmatpush3.bf16.msra.mxu1 %v1719_v32  ;;  %1520 = vmatprep.subr.bf16.mxu0 %v1720_v33 }
  0x60   : > { %1542 = vmatprep.subr.bf16.mxu1 %v1721_v34 }
  0x62   : > { %1521 = vmatpush3.bf16.msra.mxu0 %v1722_v35 }
  0x63   : > { %1543 = vmatpush3.bf16.msra.mxu1 %v1723_v36 }
  0x65   : > { %832 = vmatmul.mubr.bf16.vlgmr.msra.gmra.mxu0 %v1724_v37 }
  0x66   : > { %873 = vmatmul.mubr.bf16.vlgmr.msra.gmra.mxu1 %v1727_v39 }
 0x125   : > { %v1522_v41 = vpop.f32.mrf.mxu0 }
 0x126   : > { %v1544_v42 = vpop.f32.mrf.mxu1 }
 0x127   : > { %v1523_v43 = vpop.f32.mrf.mxu0 }
 0x128   : > { %v1524_v44 = vadd.f32 %v1523_v43, %v1522_v41  ;;  %v1545_v45 = vpop.f32.mrf.mxu1 }
 0x129   : > { %v1546_v46 = vadd.f32 %v1545_v45, %v1544_v42  ;;  %v1525_v47 = vpop.f32.mrf.mxu0 }
 0x12a   : > { %v1547_v49 = vpop.f32.mrf.mxu1 }
 0x12b   : > { %v875_v50 = vadd.f32 %v1546_v46, %v1524_v44  ;;  %v1526_v51 = vpop.f32.mrf.mxu0 }
 0x12c   : > { %v1527_v52 = vadd.f32 %v1526_v51, %v1525_v47  ;;  %v1548_v53 = vpop.f32.mrf.mxu1 }
 0x12d   : > { %v881_v54 = vadd.f32 %v875_v50, %v517_v48  ;;  %v1549_v55 = vadd.f32 %v1548_v53, %v1547_v49 }
 0x12f   : > { %883 = vst [vmem:[#allocation2] sm:$0xff] %v881_v54  ;;  %v878_v57 = vadd.f32 %v1549_v55, %v1527_v52  ;;  %888 = sbr.rel (%p1468_p6) target bundleno = 902 (0x386), region = 95 }
 0x131   : > { %v882_v58 = vadd.f32 %v878_v57, %v518_v56 }
 0x133   : > { %884 = vst [vmem:[#allocation2 + $0x8] sm:$0xff] %v882_v58 }
 0x134   : > { %v1730_v59 = vld [vmem:[%s2174_s4 + $0x38] sm:$0xff]   ;;  %v1845_v60 = vmov 0.0   ;;  %v1731_v61 = vld [vmem:[%s2174_s4 + $0x30] sm:$0xff]   ;;  %vm1846_vm0 = vmmov 0   ;;  %v1732_v62 = vld [vmem:[%s2174_s4 + $0x28] sm:$0xff]  }
 0x135   : > { %1577 = vmatprep.subr.bf16.mxu0 %v1845_v60  ;;  %1597 = vmatprep.subr.bf16.mxu1 %v1845_v60  ;;  %v1739_v63 = vld [vmem:[%s2176_s6 + $0x38] sm:$0xff]   ;;  %v1733_v0 = vld [vmem:[%s2174_s4 + $0x20] sm:$0xff]   ;;  %v1740_v1 = vld [vmem:[%s2176_s6 + $0x30] sm:$0xff]  }
 0x136   : > { %1578 = vmatpush3.bf16.msra.mxu0 %v1730_v59  ;;  %1593 = vmatprep.mubr.msk.bf16.mxu0 %vm1846_vm0, %v1845_v60  ;;  %v1734_v2 = vld [vmem:[%s2174_s4 + $0x18] sm:$0xff]   ;;  %v1741_v3 = vld [vmem:[%s2176_s6 + $0x28] sm:$0xff]   ;;  %v1735_v4 = vld [vmem:[%s2174_s4 + $0x10] sm:$0xff]  }
 0x137   : > { %1579 = vmatprep.subr.bf16.mxu0 %v1845_v60  ;;  %1613 = vmatprep.mubr.msk.bf16.mxu1 %vm1846_vm0, %v1845_v60  ;;  %v1742_v5 = vld [vmem:[%s2176_s6 + $0x20] sm:$0xff]   ;;  %v1736_v6 = vld [vmem:[%s2174_s4 + $0x8] sm:$0xff]   ;;  %v1743_v7 = vld [vmem:[%s2176_s6 + $0x18] sm:$0xff]  }
 0x138   : > { %1598 = vmatpush3.bf16.msra.mxu1 %v1739_v63  ;;  %v1737_v8 = vld [vmem:[%s2174_s4] sm:$0xff]   ;;  %v1744_v9 = vld [vmem:[%s2176_s6 + $0x10] sm:$0xff]   ;;  %v1747_v16 = vld [vmem:[%s2178_s8 + $0x38] sm:$0xff]  }
 0x139   : > { %1599 = vmatprep.subr.bf16.mxu1 %v1845_v60  ;;  %v889_v10 = vld [vmem:[#allocation2] sm:$0xff]  ;;  %v1745_v17 = vld [vmem:[%s2176_s6 + $0x8] sm:$0xff]   ;;  %v1748_v20 = vld [vmem:[%s2178_s8 + $0x30] sm:$0xff]  }
 0x13a   : > { %1580 = vmatpush3.bf16.msra.mxu0 %v1731_v61  ;;  %v890_v11 = vld [vmem:[#allocation2 + $0x8] sm:$0xff]  ;;  %v1469_v12 = vld [vmem:[%s2173_s3] ss:$0 sm:$0xff]  ;;  %v1751_v25 = vld [vmem:[%s2178_s8 + $0x18] sm:$0xff]  }
 0x13b   : > { %1581 = vmatprep.subr.bf16.mxu0 %v1845_v60  ;;  %v1738_v13 = vld [vmem:[%s2171_s1] sm:$0xff]   ;;  %v898_v14 = vadd.f32 %v1469_v12, %v889_v10  ;;  %v899_v15 = vadd.f32 %v1469_v12, %v890_v11  ;;  %v1749_v23 = vld [vmem:[%s2178_s8 + $0x28] sm:$0xff]   ;;  %v1752_v26 = vld [vmem:[%s2178_s8 + $0x10] sm:$0xff]  }
 0x13c   : > { %1600 = vmatpush3.bf16.msra.mxu1 %v1740_v1  ;;  %v1746_v21 = vld [vmem:[%s2176_s6] sm:$0xff]   ;;  %v1753_v27 = vld [vmem:[%s2178_s8 + $0x8] sm:$0xff]  }
 0x13d   : > { %1601 = vmatprep.subr.bf16.mxu1 %v1845_v60  ;;  %v900_v18 = vmax.f32 %v898_v14, 0.0  ;;  %v901_v19 = vmax.f32 %v899_v15, 0.0  ;;  %v1750_v24 = vld [vmem:[%s2178_s8 + $0x20] sm:$0xff]  }
 0x13e   : > { %1582 = vmatpush3.bf16.msra.mxu0 %v1732_v62  ;;  %v1754_v28 = vld [vmem:[%s2178_s8] sm:$0xff]  }
 0x13f   : > { %1583 = vmatprep.subr.bf16.mxu0 %v1845_v60  ;;  %v1024_v22 = vpack.c.bf16 %v901_v19, %v900_v18  ;;  %v1470_v29 = vld [vmem:[%s2175_s5] ss:$0 sm:$0xff] }
 0x140   : > { %1602 = vmatpush3.bf16.msra.mxu1 %v1741_v3  ;;  %v1480_v38 = vld [vmem:[%s2177_s7] ss:$0 sm:$0xff] }
 0x141   : > { %1603 = vmatprep.subr.bf16.mxu1 %v1845_v60  ;;  %v1489_v56 = vld [vmem:[%s2179_s9] ss:$0 sm:$0xff] }
 0x142   : > { %1584 = vmatpush3.bf16.msra.mxu0 %v1733_v0 }
 0x143   : > { %1585 = vmatprep.subr.bf16.mxu0 %v1845_v60 }
 0x144   : > { %1604 = vmatpush3.bf16.msra.mxu1 %v1742_v5 }
 0x145   : > { %1605 = vmatprep.subr.bf16.mxu1 %v1845_v60 }
 0x146   : > { %1586 = vmatpush3.bf16.msra.mxu0 %v1734_v2 }
 0x147   : > { %1587 = vmatprep.subr.bf16.mxu0 %v1845_v60 }
 0x148   : > { %1606 = vmatpush3.bf16.msra.mxu1 %v1743_v7 }
 0x149   : > { %1607 = vmatprep.subr.bf16.mxu1 %v1845_v60 }
 0x14a   : > { %1588 = vmatpush3.bf16.msra.mxu0 %v1735_v4 }
 0x14b   : > { %1589 = vmatprep.subr.bf16.mxu0 %v1845_v60 }
 0x14c   : > { %1608 = vmatpush3.bf16.msra.mxu1 %v1744_v9 }
 0x14d   : > { %1609 = vmatprep.subr.bf16.mxu1 %v1845_v60 }
 0x14e   : > { %1590 = vmatpush3.bf16.msra.mxu0 %v1736_v6 }
 0x14f   : > { %1591 = vmatprep.subr.bf16.mxu0 %v1845_v60 }
 0x150   : > { %1610 = vmatpush3.bf16.msra.mxu1 %v1745_v17 }
 0x151   : > { %1611 = vmatprep.subr.bf16.mxu1 %v1845_v60 }
 0x152   : > { %1592 = vmatpush3.bf16.msra.mxu0 %v1737_v8 }
 0x153   : > { %1617 = vmatprep.subr.bf16.mxu0 %v1845_v60 }
 0x154   : > { %1612 = vmatpush3.bf16.msra.mxu1 %v1746_v21 }
 0x155   : > { %1594 = vmatmul.mubr.bf16.vlgmr.msra.gmra.mxu0 %v1738_v13 }
 0x156   : > { %1618 = vmatpush3.bf16.msra.mxu0 %v1747_v16  ;;  %1633 = vmatprep.mubr.msk.bf16.mxu0 %vm1846_vm0, %v1845_v60 }
 0x157   : > { %1619 = vmatprep.subr.bf16.mxu0 %v1845_v60  ;;  %1614 = vmatmul.mubr.bf16.vlgmr.msra.gmra.mxu1 %v1024_v22 }
 0x15a   : > { %1620 = vmatpush3.bf16.msra.mxu0 %v1748_v20 }
 0x15b   : > { %1621 = vmatprep.subr.bf16.mxu0 %v1845_v60 }
 0x15e   : > { %1622 = vmatpush3.bf16.msra.mxu0 %v1749_v23 }
 0x15f   : > { %1623 = vmatprep.subr.bf16.mxu0 %v1845_v60 }
 0x162   : > { %1624 = vmatpush3.bf16.msra.mxu0 %v1750_v24 }
 0x163   : > { %1625 = vmatprep.subr.bf16.mxu0 %v1845_v60 }
 0x166   : > { %1626 = vmatpush3.bf16.msra.mxu0 %v1751_v25 }
 0x167   : > { %1627 = vmatprep.subr.bf16.mxu0 %v1845_v60 }
 0x16a   : > { %1628 = vmatpush3.bf16.msra.mxu0 %v1752_v26 }
 0x16b   : > { %1629 = vmatprep.subr.bf16.mxu0 %v1845_v60 }
 0x16e   : > { %1630 = vmatpush3.bf16.msra.mxu0 %v1753_v27 }
 0x16f   : > { %1631 = vmatprep.subr.bf16.mxu0 %v1845_v60 }
 0x172   : > { %1632 = vmatpush3.bf16.msra.mxu0 %v1754_v28 }
 0x215   : > { %v1015_v30 = vpop.f32.mrf.mxu0 }
 0x216   : > { %v1016_v32 = vadd.f32 %v1470_v29, %v1015_v30 }
 0x217   : > { %v1595_v31 = vpop.f32.mrf.mxu0  ;;  %v1130_v40 = vpop.f32.mrf.mxu1 }
 0x218   : > { %v1022_v36 = vmax.f32 %v1016_v32, 0.0  ;;  %v1131_v41 = vadd.f32 %v1480_v38, %v1130_v40 }
 0x219   : > { %v1018_v33 = vpop.f32.mrf.mxu0  ;;  %v1615_v42 = vpop.f32.mrf.mxu1 }
 0x21a   : > { %v1019_v34 = vadd.f32 %v1470_v29, %v1018_v33  ;;  %v1250_v43 = vmul.f32 %v1131_v41, %v1131_v41 }
 0x21b   : > { %v1596_v35 = vpop.f32.mrf.mxu0  ;;  %v1133_v44 = vpop.f32.mrf.mxu1 }
 0x21c   : > { %v1023_v37 = vmax.f32 %v1019_v34, 0.0  ;;  %v1134_v45 = vadd.f32 %v1480_v38, %v1133_v44  ;;  %1252 = vadd.xlane.f32.xlu0 %v1250_v43 }
 0x21d   : > { %v1616_v46 = vpop.f32.mrf.mxu1 }
 0x21e   : > { %v1137_v39 = vpack.c.bf16 %v1023_v37, %v1022_v36  ;;  %v1251_v47 = vmul.f32 %v1134_v45, %v1134_v45 }
 0x220   : > { %1634 = vmatmul.mubr.bf16.vlgmr.msra.gmra.mxu0 %v1137_v39  ;;  %1254 = vadd.xlane.f32.xlu0 %v1251_v47 }
 0x2a5   : > { %v1253_v48 = vpop.xlane.xlu0 %1252 }
 0x2a6   : > { %v1256_v49 = vmax.f32 %v1253_v48, 1e-24 }
 0x2a8   : > { %1755 = vrsqrt.f32 %v1256_v49 }
 0x2a9   : > { %v1255_v50 = vpop.xlane.xlu0 %1254 }
 0x2aa   : > { %v1257_v51 = vmax.f32 %v1255_v50, 1e-24 }
 0x2ac   : > { %1757 = vrsqrt.f32 %v1257_v51 }
 0x2b5   : > { %v1756_v52 = vpop.eup %1755 }
 0x2b6   : > { %v1270_v53 = vmul.f32 %v1756_v52, %v1131_v41 }
 0x2b8   : > { %1272 = vst [vmem:[%s2180_s10] sm:$0xff] %v1270_v53 }
 0x2b9   : > { %v1758_v54 = vpop.eup %1757 }
 0x2ba   : > { %v1271_v55 = vmul.f32 %v1758_v54, %v1134_v45 }
 0x2bc   : > { %1273 = vst [vmem:[%s2180_s10 + $0x8] sm:$0xff] %v1271_v55 }
 0x2e0   : > { %v1243_v57 = vpop.f32.mrf.mxu0 }
 0x2e1   : > { %v1244_v58 = vadd.f32 %v1489_v56, %v1243_v57 }
 0x2e2   : > { %v1635_v59 = vpop.f32.mrf.mxu0 }
 0x2e3   : > { %v1260_v60 = vmul.f32 %v1244_v58, %v1244_v58 }
 0x2e4   : > { %v1246_v61 = vpop.f32.mrf.mxu0 }
 0x2e5   : > { %v1247_v62 = vadd.f32 %v1489_v56, %v1246_v61  ;;  %1262 = vadd.xlane.f32.xlu1 %v1260_v60 }
 0x2e6   : > { %v1636_v63 = vpop.f32.mrf.mxu0 }
 0x2e7   : > { %v1261_v0 = vmul.f32 %v1247_v62, %v1247_v62 }
 0x2e9   : > { %1264 = vadd.xlane.f32.xlu1 %v1261_v0 }
 0x36e   : > { %v1263_v1 = vpop.xlane.xlu1 %1262 }
 0x36f   : > { %v1266_v2 = vmax.f32 %v1263_v1, 1e-24 }
 0x371   : > { %1759 = vrsqrt.f32 %v1266_v2 }
 0x372   : > { %v1265_v3 = vpop.xlane.xlu1 %1264 }
 0x373   : > { %v1267_v4 = vmax.f32 %v1265_v3, 1e-24 }
 0x375   : > { %1761 = vrsqrt.f32 %v1267_v4 }
 0x37e   : > { %v1760_v5 = vpop.eup %1759 }
 0x37f   : > { %v1274_v6 = vmul.f32 %v1760_v5, %v1244_v58 }
 0x381   : > { %1276 = vst [vmem:[%s2181_s11] sm:$0xff] %v1274_v6 }
 0x382   : > { %v1762_v7 = vpop.eup %1761 }
 0x383   : > { %v1275_v8 = vmul.f32 %v1762_v7, %v1247_v62 }
 0x385   : > { %1277 = vst [vmem:[%s2181_s11 + $0x8] sm:$0xff] %v1275_v8 }
 0x386 PF: > { %s25_s22 = sadd.s32 1, %s1839_s22   ;;  %s2189_s12 = sld [smem:[#allocation8_spill]] }
 0x387   : > { %p22_p7 = scmp.ge.s32.totalorder %s25_s22, 4   ;;  %s2190_s15 = sld [smem:[#allocation7_spill]] }
 0x388   : > { %s2191_s17 = smov %s1823_s18  ;;  %s2192_s18 = smov %s1827_s19 }
 0x389   : > { %s2194_s20 = smov %s1835_s21  ;;  %24 = sbr.rel (!%p22_p7) target bundleno = 6 (0x6), region = 154 }
 0x38c   : > { %s2193_s19 = smov %s2189_s12 }
 0x38d   : > { %s2195_s21 = smov %s2190_s15 }
 0x38e   :  { %1317 = vsyncpa [#allocation5], 1 }
 0x38f   :  { %1319 = vsyncpa [#allocation5 + $0x1], 1 }

</bundles_post_ra>
